<compile_context>
chip_gen: v7x
topology: tpu7x:2x2x1
jax: 0.10.0
libtpu: 0.0.40
codegen_flags: <defaults>
</compile_context>

<pallas_src>
import functools

import jax
import jax.numpy as jnp
from jax.experimental import pallas as pl
from jax.experimental.pallas import tpu as pltpu

HIDDEN = 128   # hidden width of the DQN MLP (fixed by the PyTorch module)


def _round_up(x, m):
    return (x + m - 1) // m * m


def _batch_tile(B, block_b):
    """Batch tile: multiple of 16 (bf16 sublane packing), capped by block_b
    (VMEM budget; v7x has only 64 MiB), and split into >=2 grid steps once the
    batch is big enough so both v7x TensorCores get work."""
    block_b = max(16, block_b // 16 * 16)
    tb = _round_up(B, 16)
    if tb > 256:                      # big enough to be worth splitting (v7x 2 TCs)
        tb = _round_up(pl.cdiv(B, 2), 16)
    return max(16, min(tb, block_b))


def _vmem_limit_bytes():
    """64 MiB on 128-MiB-VMEM chips (v5e/v6e), 40 MiB on v7x (64 MiB physical)."""
    try:
        cap = pltpu.get_tpu_info().vmem_capacity_bytes
    except Exception:
        cap = 64 * 1024 * 1024        # conservative fallback (v7x-sized)
    return (64 if cap >= 128 * 1024 * 1024 else 40) * 1024 * 1024


def dqn_kernel(x_ref, w1_ref, b1_ref, w2_ref, b2_ref, w3_ref, b3_ref, out_ref):
    # x tile: (TB, n_obs) f32 -> bf16 in-kernel (free; VPU slot has slack).
    # Weights: bf16, VMEM-resident (constant index_map, DMA'd once).
    # Accumulate in f32 (preferred_element_type); bias adds + ReLU stay f32.
    x = x_ref[...].astype(jnp.bfloat16)
    h1 = jnp.dot(x, w1_ref[...], preferred_element_type=jnp.float32) + b1_ref[...]
    h1 = jnp.maximum(h1, 0.0)
    h2 = jnp.dot(h1.astype(jnp.bfloat16), w2_ref[...],
                 preferred_element_type=jnp.float32) + b2_ref[...]
    h2 = jnp.maximum(h2, 0.0)
    out = jnp.dot(h2.astype(jnp.bfloat16), w3_ref[...],
                  preferred_element_type=jnp.float32) + b3_ref[...]
    out_ref[...] = out                 # (TB, n_actions) f32, unpadded writeback


def prepare_params(params):
    """One-time prep (call at init / after each optimizer step, NOT per forward):
    cast matmul operands to bf16, biases to f32 row vectors."""
    w1, b1, w2, b2, w3, b3 = params
    return (w1.astype(jnp.bfloat16), b1.reshape(1, -1).astype(jnp.float32),
            w2.astype(jnp.bfloat16), b2.reshape(1, -1).astype(jnp.float32),
            w3.astype(jnp.bfloat16), b3.reshape(1, -1).astype(jnp.float32))


@functools.partial(jax.jit, static_argnames=("block_b",))
def dqn_forward(x, prepared_params, block_b=4096):
    """Q = layer3(relu(layer2(relu(layer1(x))))) for x of shape (B, n_observations)."""
    w1, b1, w2, b2, w3, b3 = prepared_params
    B, n_obs = x.shape
    hidden = w1.shape[1]
    n_actions = w3.shape[1]

    tb = _batch_tile(B, block_b)
    grid = (pl.cdiv(B, tb),)           # partial last block: OOB reads ignored,
                                       # OOB output rows masked on writeback
    const = lambda i: (0, 0)           # weights pinned: same block every grid step

    out = pl.pallas_call(
        dqn_kernel,
        out_shape=jax.ShapeDtypeStruct((B, n_actions), jnp.float32),
        grid_spec=pltpu.PrefetchScalarGridSpec(
            num_scalar_prefetch=0,
            grid=grid,
            in_specs=[
                pl.BlockSpec((tb, n_obs), lambda i: (i, 0)),   # x: tiled over batch
                pl.BlockSpec((n_obs, hidden), const),          # w1 (VMEM resident)
                pl.BlockSpec((1, hidden), const),              # b1
                pl.BlockSpec((hidden, hidden), const),         # w2
                pl.BlockSpec((1, hidden), const),              # b2
                pl.BlockSpec((hidden, n_actions), const),      # w3
                pl.BlockSpec((1, n_actions), const),           # b3
            ],
            out_specs=pl.BlockSpec((tb, n_actions), lambda i: (i, 0)),
        ),
        compiler_params=pltpu.CompilerParams(
            dimension_semantics=("parallel",),   # shard batch tiles across TCs (v7x)
            vmem_limit_bytes=_vmem_limit_bytes(),
        ),
    )(x, w1, b1, w2, b2, w3, b3)
    return out


def init_params(key, n_observations, n_actions):
    # Mimics PyTorch nn.Linear default init: U(-1/sqrt(fan_in), 1/sqrt(fan_in)).
    def linear(key, fan_in, fan_out):
        kw, kb = jax.random.split(key)
        bound = 1.0 / jnp.sqrt(jnp.float32(fan_in))
        w = jax.random.uniform(kw, (fan_in, fan_out), jnp.float32, -bound, bound)
        b = jax.random.uniform(kb, (fan_out,), jnp.float32, -bound, bound)
        return w, b

    k1, k2, k3 = jax.random.split(key, 3)
    w1, b1 = linear(k1, n_observations, HIDDEN)
    w2, b2 = linear(k2, HIDDEN, HIDDEN)
    w3, b3 = linear(k3, HIDDEN, n_actions)
    return (w1, b1, w2, b2, w3, b3)


def dqn_reference(x, params):
    w1, b1, w2, b2, w3, b3 = params
    h1 = jnp.maximum(x @ w1 + b1, 0.0)
    h2 = jnp.maximum(h1 @ w2 + b2, 0.0)
    return h2 @ w3 + b3


if __name__ == "__main__":
    key = jax.random.PRNGKey(0)
    k_param, k_x1, k_x2, k_x3 = jax.random.split(key, 4)

    n_observations = 32
    n_actions = 8
    params = init_params(k_param, n_observations, n_actions)
    prepared = prepare_params(params)   # one-time bf16 cast, hoisted out of forward

    # Small aligned batch (single grid step).
    x1 = jax.random.normal(k_x1, (8, n_observations), jnp.float32)
    out1 = jax.block_until_ready(dqn_forward(x1, prepared))
    ref1 = dqn_reference(x1, params)
    assert out1.shape == (8, n_actions)
    # bf16 matmul operands with f32 accumulation -> ~1e-2 error budget.
    assert jnp.allclose(out1, ref1, atol=5e-2, rtol=5e-2), float(jnp.max(jnp.abs(out1 - ref1)))

    # Ragged batch (tile = 32 rows, 20 real): exercises masked output writeback.
    x2 = jax.random.normal(k_x2, (20, n_observations), jnp.float32)
    out2 = jax.block_until_ready(dqn_forward(x2, prepared))
    ref2 = dqn_reference(x2, params)
    assert out2.shape == (20, n_actions)
    assert jnp.allclose(out2, ref2, atol=5e-2, rtol=5e-2), float(jnp.max(jnp.abs(out2 - ref2)))

    # Multi-step grid (2 batch tiles -> both v7x TensorCores) with a ragged tail.
    x3 = jax.random.normal(k_x3, (300, n_observations), jnp.float32)
    out3 = jax.block_until_ready(dqn_forward(x3, prepared))
    ref3 = dqn_reference(x3, params)
    assert out3.shape == (300, n_actions)
    assert jnp.allclose(out3, ref3, atol=5e-2, rtol=5e-2), float(jnp.max(jnp.abs(out3 - ref3)))

    print("KERNEL_OK")
</pallas_src>

<mosaic_0001>
module attributes {stable_mosaic.version = 11 : i64} {
  func.func @dqn_kernel(%arg0: i32, %arg1: memref<16x32xf32, #tpu.memory_space<vmem>>, %arg2: memref<32x128xbf16, #tpu.memory_space<vmem>>, %arg3: memref<1x128xf32, #tpu.memory_space<vmem>>, %arg4: memref<128x128xbf16, #tpu.memory_space<vmem>>, %arg5: memref<1x128xf32, #tpu.memory_space<vmem>>, %arg6: memref<128x8xbf16, #tpu.memory_space<vmem>>, %arg7: memref<1x8xf32, #tpu.memory_space<vmem>>, %arg8: memref<16x8xf32, #tpu.memory_space<vmem>>) attributes {dimension_semantics = [#tpu.dimension_semantics<parallel>], iteration_bounds = array<i64: 1>, scalar_prefetch = 0 : i64, scratch_operands = 0 : i64, tpu.core_type = #tpu.core_type<tc>, window_params = [{transform_indices = @transform_0, window_bounds = array<i64: 16, 32>}, {pipeline_mode = #tpu.pipeline_mode<synchronous>, transform_indices = @transform_1, window_bounds = array<i64: 32, 128>}, {pipeline_mode = #tpu.pipeline_mode<synchronous>, transform_indices = @transform_2, window_bounds = array<i64: 1, 128>}, {pipeline_mode = #tpu.pipeline_mode<synchronous>, transform_indices = @transform_3, window_bounds = array<i64: 128, 128>}, {pipeline_mode = #tpu.pipeline_mode<synchronous>, transform_indices = @transform_4, window_bounds = array<i64: 1, 128>}, {pipeline_mode = #tpu.pipeline_mode<synchronous>, transform_indices = @transform_5, window_bounds = array<i64: 128, 8>}, {pipeline_mode = #tpu.pipeline_mode<synchronous>, transform_indices = @transform_6, window_bounds = array<i64: 1, 8>}, {transform_indices = @transform_7, window_bounds = array<i64: 16, 8>}]} {
    %c0 = arith.constant 0 : index
    %c0_0 = arith.constant 0 : index
    %0 = vector.load %arg1[%c0, %c0_0] : memref<16x32xf32, #tpu.memory_space<vmem>>, vector<16x32xf32>
    %1 = arith.truncf %0 : vector<16x32xf32> to vector<16x32xbf16>
    %c0_1 = arith.constant 0 : index
    %c0_2 = arith.constant 0 : index
    %2 = vector.load %arg2[%c0_1, %c0_2] : memref<32x128xbf16, #tpu.memory_space<vmem>>, vector<32x128xbf16>
    %cst = arith.constant dense<0.000000e+00> : vector<16x128xf32>
    %3 = tpu.matmul %1, %2, %cst {dimension_numbers = #tpu.dot_dimension_numbers<[1], [0], [0], [1], [0, 0, 1, 1], [], []>} : vector<16x32xbf16>, vector<32x128xbf16>, vector<16x128xf32> -> vector<16x128xf32>
    %c0_3 = arith.constant 0 : index
    %c0_4 = arith.constant 0 : index
    %4 = vector.load %arg3[%c0_3, %c0_4] : memref<1x128xf32, #tpu.memory_space<vmem>>, vector<1x128xf32>
    %5 = vector.broadcast %4 : vector<1x128xf32> to vector<16x128xf32>
    %6 = arith.addf %3, %5 : vector<16x128xf32>
    %cst_5 = arith.constant 0.000000e+00 : f32
    %7 = vector.broadcast %cst_5 : f32 to vector<16x128xf32>
    %8 = arith.maximumf %6, %7 : vector<16x128xf32>
    %9 = arith.truncf %8 : vector<16x128xf32> to vector<16x128xbf16>
    %c0_6 = arith.constant 0 : index
    %c0_7 = arith.constant 0 : index
    %10 = vector.load %arg4[%c0_6, %c0_7] : memref<128x128xbf16, #tpu.memory_space<vmem>>, vector<128x128xbf16>
    %cst_8 = arith.constant dense<0.000000e+00> : vector<16x128xf32>
    %11 = tpu.matmul %9, %10, %cst_8 {dimension_numbers = #tpu.dot_dimension_numbers<[1], [0], [0], [1], [0, 0, 1, 1], [], []>} : vector<16x128xbf16>, vector<128x128xbf16>, vector<16x128xf32> -> vector<16x128xf32>
    %c0_9 = arith.constant 0 : index
    %c0_10 = arith.constant 0 : index
    %12 = vector.load %arg5[%c0_9, %c0_10] : memref<1x128xf32, #tpu.memory_space<vmem>>, vector<1x128xf32>
    %13 = vector.broadcast %12 : vector<1x128xf32> to vector<16x128xf32>
    %14 = arith.addf %11, %13 : vector<16x128xf32>
    %cst_11 = arith.constant 0.000000e+00 : f32
    %15 = vector.broadcast %cst_11 : f32 to vector<16x128xf32>
    %16 = arith.maximumf %14, %15 : vector<16x128xf32>
    %17 = arith.truncf %16 : vector<16x128xf32> to vector<16x128xbf16>
    %c0_12 = arith.constant 0 : index
    %c0_13 = arith.constant 0 : index
    %18 = vector.load %arg6[%c0_12, %c0_13] : memref<128x8xbf16, #tpu.memory_space<vmem>>, vector<128x8xbf16>
    %cst_14 = arith.constant dense<0.000000e+00> : vector<16x8xf32>
    %19 = tpu.matmul %17, %18, %cst_14 {dimension_numbers = #tpu.dot_dimension_numbers<[1], [0], [0], [1], [0, 0, 1, 1], [], []>} : vector<16x128xbf16>, vector<128x8xbf16>, vector<16x8xf32> -> vector<16x8xf32>
    %c0_15 = arith.constant 0 : index
    %c0_16 = arith.constant 0 : index
    %20 = vector.load %arg7[%c0_15, %c0_16] : memref<1x8xf32, #tpu.memory_space<vmem>>, vector<1x8xf32>
    %21 = vector.broadcast %20 : vector<1x8xf32> to vector<16x8xf32>
    %22 = arith.addf %19, %21 : vector<16x8xf32>
    %c0_17 = arith.constant 0 : index
    %c0_18 = arith.constant 0 : index
    %23 = vector.load %arg8[%c0_17, %c0_18] : memref<16x8xf32, #tpu.memory_space<vmem>>, vector<16x8xf32>
    tpu.vector_store %arg8[%c0_17, %c0_18], %22 {strides = array<i32>} : memref<16x8xf32, #tpu.memory_space<vmem>>, vector<16x8xf32>,
    return
  }
  func.func @transform_0(%arg0: i32) -> (i32, i32) {
    %c0_i32 = arith.constant 0 : i32
    %c0_i32_0 = arith.constant 0 : i32
    return %arg0, %c0_i32 : i32, i32
  }
  func.func @transform_1(%arg0: i32) -> (i32, i32) {
    %c0_i32 = arith.constant 0 : i32
    %c0_i32_0 = arith.constant 0 : i32
    %c0_i32_1 = arith.constant 0 : i32
    return %c0_i32, %c0_i32_0 : i32, i32
  }
  func.func @transform_2(%arg0: i32) -> (i32, i32) {
    %c0_i32 = arith.constant 0 : i32
    %c0_i32_0 = arith.constant 0 : i32
    %c0_i32_1 = arith.constant 0 : i32
    return %c0_i32, %c0_i32_0 : i32, i32
  }
  func.func @transform_3(%arg0: i32) -> (i32, i32) {
    %c0_i32 = arith.constant 0 : i32
    %c0_i32_0 = arith.constant 0 : i32
    %c0_i32_1 = arith.constant 0 : i32
    return %c0_i32, %c0_i32_0 : i32, i32
  }
  func.func @transform_4(%arg0: i32) -> (i32, i32) {
    %c0_i32 = arith.constant 0 : i32
    %c0_i32_0 = arith.constant 0 : i32
    %c0_i32_1 = arith.constant 0 : i32
    return %c0_i32, %c0_i32_0 : i32, i32
  }
  func.func @transform_5(%arg0: i32) -> (i32, i32) {
    %c0_i32 = arith.constant 0 : i32
    %c0_i32_0 = arith.constant 0 : i32
    %c0_i32_1 = arith.constant 0 : i32
    return %c0_i32, %c0_i32_0 : i32, i32
  }
  func.func @transform_6(%arg0: i32) -> (i32, i32) {
    %c0_i32 = arith.constant 0 : i32
    %c0_i32_0 = arith.constant 0 : i32
    %c0_i32_1 = arith.constant 0 : i32
    return %c0_i32, %c0_i32_0 : i32, i32
  }
  func.func @transform_7(%arg0: i32) -> (i32, i32) {
    %c0_i32 = arith.constant 0 : i32
    %c0_i32_0 = arith.constant 0 : i32
    return %arg0, %c0_i32 : i32, i32
  }
}

</mosaic_0001>

<bundles_post_ra>
// kernel: dqn_forward.1
= control target key start
LH: loop header
LB: loop body
LE: loop exit
PB: predicated region body
PF: predicated region fallthrough
CT: control target
= control target key end

     0   :  { %12 = vsyncpa [#allocation3], 0  ;;  %s687_s0 = inlined_call_operand.vmem [shape: f32[8,32], index: 0, kind: input, shape index: {}]   ;;  %s688_s1 = inlined_call_operand.hbm [shape: bf16[32,128], index: 1, kind: input, shape index: {}]   ;;  %s689_s2 = inlined_call_operand.vmem [shape: f32[1,128], index: 2, kind: input, shape index: {}]   ;;  %s690_s3 = inlined_call_operand.vmem [shape: bf16[128,128], index: 3, kind: input, shape index: {}]   ;;  %s691_s4 = inlined_call_operand.vmem [shape: f32[1,128], index: 4, kind: input, shape index: {}]   ;;  %s692_s5 = inlined_call_operand.vmem [shape: bf16[128,8], index: 5, kind: input, shape index: {}]   ;;  %s693_s6 = inlined_call_operand.vmem [shape: f32[1,8], index: 6, kind: input, shape index: {}]   ;;  %s694_s7 = inlined_call_operand.hbm [shape: f32[8,8], index: 7, kind: output, shape index: {}]  }
   0x1   :  { %13 = vsyncpa [#allocation4], 0  ;;  %s528_s24 = smov [#allocation2]   ;;  %s480_s28 = scalar_lea.hbm %s688_s1, 256 }
   0x2   :  { %s21_s25 = sshll.u32 %s528_s24, 4  ;;  %p481_p0 = scmp.ne.s32.totalorder %s688_s1, %s480_s28  ;;  %s22_s25 = int_to_ptr.vmem [resolvable:$true] %s21_s25 }
   0x3   :  { %p484_p1 = scmp.lt.u32.totalorder %s480_s28, %s688_s1 }
   0x5   :  { %p486_p2 = pnand %p484_p1, %p481_p0 }
   0x7   :  { %489 = shalt.err (!%p486_p2)
}
   0x8   :  { %s490_s10 = scalar_lea.vmem %s22_s25, 256  ;;  %p495_p4 = scmp.lt.s32.totalorder %s22_s25, %s22_s25 }
   0x9   :  { %p491_p3 = scmp.ne.s32.totalorder %s22_s25, %s490_s10  ;;  %p496_p5 = scmp.lt.s32.totalorder %s490_s10, %s490_s10 }
   0xb   :  { %p497_p6 = por %p496_p5, %p495_p4 }
   0xd   :  { %p498_p7 = pnand %p497_p6, %p491_p3 }
   0xf   :  { %501 = shalt.err (!%p498_p7)
}
  0x10   :  { %s529_s11 = smov 64   ;;  %s530_s12 = smov 4  }
  0x11   :  { %27 = dma.hbm_to_vmem [thread:$0]  %s688_s1, 256, %s22_s25, [#allocation3], %s529_s11, %s529_s11, %s530_s12  }
  0x12   :  { %524 = dma.done.wait [#allocation3], 256  }
  0x13   :  { %525 = vsyncadd [#allocation3], 4294967040  ;;  %v531_v0 = vmov 0.0   ;;  %vm532_vm0 = vmmov 0   ;;  %v462_v1 = vld [vmem:[#allocation2] sm:$0xff]   ;;  %v463_v2 = vld [vmem:[#allocation2 + $0x8] sm:$0xff]  }
  0x14   :  { %406 = vmatprep.subr.bf16.mxu0 %v531_v0  ;;  %410 = vmatprep.mubr.msk.bf16.mxu0 %vm532_vm0, %v531_v0  ;;  %v42_v3 = vld [vmem:[%s687_s0] sm:$0xff]  ;;  %v43_v4 = vld [vmem:[%s687_s0 + $0x8] sm:$0xff]  ;;  %vm68_vm1 = vcmask 261120   ;;  %v466_v8 = vld [vmem:[%s690_s3 + $0x10] sm:$0xff]   ;;  %vm343_vm2 = vcmask 64512  }
  0x15   :  { %414 = vmatprep.subr.bf16.mxu1 %v531_v0  ;;  %430 = vmatprep.mubr.msk.bf16.mxu1 %vm532_vm0, %v531_v0  ;;  %v464_v5 = vld [vmem:[%s690_s3] sm:$0xff]   ;;  %v44_v6 = vpack.c.bf16 %v43_v4, %v42_v3  ;;  %v465_v7 = vld [vmem:[%s690_s3 + $0x8] sm:$0xff]   ;;  %v467_v9 = vld [vmem:[%s690_s3 + $0x18] sm:$0xff]  }
  0x16   :  { %407 = vmatpush3.bf16.msra.mxu0 %v462_v1  ;;  %415 = vmatpush3.bf16.msra.mxu1 %v464_v5  ;;  %v468_v10 = vld [vmem:[%s690_s3 + $0x20] sm:$0xff]   ;;  %v469_v11 = vld [vmem:[%s690_s3 + $0x28] sm:$0xff]   ;;  %v470_v12 = vld [vmem:[%s690_s3 + $0x30] sm:$0xff]  }
  0x17   :  { %408 = vmatprep.subr.bf16.mxu0 %v531_v0  ;;  %416 = vmatprep.subr.bf16.mxu1 %v531_v0  ;;  %v471_v13 = vld [vmem:[%s690_s3 + $0x38] sm:$0xff]   ;;  %v472_v14 = vld [vmem:[%s692_s5] sm:$0xff]   ;;  %v473_v15 = vld [vmem:[%s692_s5 + $0x8] sm:$0xff]  }
  0x18   :  { %v474_v16 = vld [vmem:[%s692_s5 + $0x10] sm:$0xff]   ;;  %v475_v17 = vld [vmem:[%s692_s5 + $0x18] sm:$0xff]   ;;  %v476_v18 = vld [vmem:[%s692_s5 + $0x20] sm:$0xff]  }
  0x19   :  { %v477_v19 = vld [vmem:[%s692_s5 + $0x28] sm:$0xff]   ;;  %v363_v20 = vld [vmem:[%s689_s2] ss:$0 sm:$0xff]  ;;  %v478_v30 = vld [vmem:[%s692_s5 + $0x30] sm:$0xff]  }
  0x1a   :  { %409 = vmatpush3.bf16.msra.mxu0 %v463_v2  ;;  %417 = vmatpush3.bf16.msra.mxu1 %v465_v7  ;;  %v479_v31 = vld [vmem:[%s692_s5 + $0x38] sm:$0xff]   ;;  %v367_v32 = vld [vmem:[%s691_s4] ss:$0 sm:$0xff] }
  0x1b   :  { %434 = vmatprep.subr.bf16.mxu0 %v531_v0  ;;  %418 = vmatprep.subr.bf16.mxu1 %v531_v0  ;;  %v376_v42 = vld [vmem:[%s693_s6] ss:$0 sm:$0xff] }
  0x1d   :  { %411 = vmatmul.mubr.msk.bf16.vlgmr.msra.gmra.mrb[0].mxu0 %vm68_vm1, %v44_v6 }
  0x1e   :  { %450 = vmatprep.mubr.msk.bf16.mxu0 %vm532_vm0, %v531_v0  ;;  %419 = vmatpush3.bf16.msra.mxu1 %v466_v8 }
  0x1f   :  { %420 = vmatprep.subr.bf16.mxu1 %v531_v0  ;;  %435 = vmatpush3.bf16.msra.mxu0 %v472_v14 }
  0x20   :  { %436 = vmatprep.subr.bf16.mxu0 %v531_v0 }
  0x22   :  { %421 = vmatpush3.bf16.msra.mxu1 %v467_v9 }
  0x23   :  { %422 = vmatprep.subr.bf16.mxu1 %v531_v0  ;;  %437 = vmatpush3.bf16.msra.mxu0 %v473_v15 }
  0x24   :  { %438 = vmatprep.subr.bf16.mxu0 %v531_v0 }
  0x26   :  { %423 = vmatpush3.bf16.msra.mxu1 %v468_v10 }
  0x27   :  { %424 = vmatprep.subr.bf16.mxu1 %v531_v0  ;;  %439 = vmatpush3.bf16.msra.mxu0 %v474_v16 }
  0x28   :  { %440 = vmatprep.subr.bf16.mxu0 %v531_v0 }
  0x2a   :  { %425 = vmatpush3.bf16.msra.mxu1 %v469_v11 }
  0x2b   :  { %426 = vmatprep.subr.bf16.mxu1 %v531_v0  ;;  %441 = vmatpush3.bf16.msra.mxu0 %v475_v17 }
  0x2c   :  { %442 = vmatprep.subr.bf16.mxu0 %v531_v0 }
  0x2e   :  { %427 = vmatpush3.bf16.msra.mxu1 %v470_v12 }
  0x2f   :  { %428 = vmatprep.subr.bf16.mxu1 %v531_v0  ;;  %443 = vmatpush3.bf16.msra.mxu0 %v476_v18 }
  0x30   :  { %444 = vmatprep.subr.bf16.mxu0 %v531_v0 }
  0x32   :  { %429 = vmatpush3.bf16.msra.mxu1 %v471_v13 }
  0x33   :  { %445 = vmatpush3.bf16.msra.mxu0 %v477_v19 }
  0x34   :  { %446 = vmatprep.subr.bf16.mxu0 %v531_v0 }
  0x37   :  { %447 = vmatpush3.bf16.msra.mxu0 %v478_v30 }
  0x38   :  { %448 = vmatprep.subr.bf16.mxu0 %v531_v0 }
  0x3b   :  { %449 = vmatpush3.bf16.msra.mxu0 %v479_v31 }
  0xf0   :  { %v106_v21 = vpop.f32.mrb[0].mxu0 }
  0xf1   :  { %v107_v22 = vadd.f32 %v363_v20, %v106_v21  ;;  %v412_v23 = vpop.f32.mrb[1].mxu0 }
  0xf2   :  { %v109_v24 = vpop.f32.mrb[2].mxu0 }
  0xf3   :  { %v110_v25 = vadd.f32 %v363_v20, %v109_v24  ;;  %v413_v26 = vpop.f32.mrb[3].mxu0  ;;  %v113_v27 = vmax.f32 %v107_v22, 0.0 }
  0xf5   :  { %v114_v28 = vmax.f32 %v110_v25, 0.0 }
  0xf7   :  { %v115_v29 = vpack.c.bf16 %v114_v28, %v113_v27 }
  0xf9   :  { %431 = vmatmul.mubr.bf16.vlgmr.msra.gmra.mrb[0].mxu1 %v115_v29 }
 0x1cc   :  { %v221_v33 = vpop.f32.mrb[0].mxu1 }
 0x1cd   :  { %v222_v34 = vadd.f32 %v367_v32, %v221_v33  ;;  %v432_v35 = vpop.f32.mrb[1].mxu1 }
 0x1ce   :  { %v224_v36 = vpop.f32.mrb[2].mxu1 }
 0x1cf   :  { %v225_v37 = vadd.f32 %v367_v32, %v224_v36  ;;  %v433_v38 = vpop.f32.mrb[3].mxu1  ;;  %v228_v39 = vmax.f32 %v222_v34, 0.0 }
 0x1d1   :  { %v229_v40 = vmax.f32 %v225_v37, 0.0 }
 0x1d3   :  { %v230_v41 = vpack.c.bf16 %v229_v40, %v228_v39 }
 0x1d5   :  { %451 = vmatmul.mubr.bf16.vlgmr.msra.gmra.mrb[4].mxu0 %v230_v41 }
 0x2a8   :  { %v336_v43 = vpop.f32.mrb[4].mxu0 }
 0x2a9   :  { %v337_v44 = vadd.f32 %v376_v42, %v336_v43  ;;  %v452_v45 = vpop.f32.mrb[5].mxu0 }
 0x2aa   :  { %v339_v46 = vpop.f32.mrb[6].mxu0 }
 0x2ab   :  { %344 = vst.msk [vmem:[#allocation5] sm:$0xff] %vm343_vm2, %v337_v44  ;;  %v340_v47 = vadd.f32 %v376_v42, %v339_v46  ;;  %v453_v48 = vpop.f32.mrb[7].mxu0 }
 0x2ad   :  { %345 = vst.msk [vmem:[#allocation5 + $0x8] sm:$0xff] %vm343_vm2, %v340_v47 }
 0x2ae   :  { %350 = vsyncadd [#allocation4], 128  ;;  %s533_s4 = smov [#allocation5]  }
 0x2af   :  { %s351_s5 = sshll.u32 %s533_s4, 4  ;;  %s352_s5 = int_to_ptr.vmem [resolvable:$true] %s351_s5 }
 0x2b0   :  { %s502_s28 = scalar_lea.vmem %s352_s5, 128  ;;  %s506_s29 = scalar_lea.vmem %s352_s5, 256 }
 0x2b1   :  { %p503_p8 = scmp.ne.s32.totalorder %s352_s5, %s502_s28  ;;  %p507_p9 = scmp.lt.s32.totalorder %s352_s5, %s352_s5 }
 0x2b2   :  { %p508_p10 = scmp.lt.s32.totalorder %s506_s29, %s502_s28 }
 0x2b4   :  { %p509_p11 = por %p508_p10, %p507_p9 }
 0x2b6   :  { %p510_p12 = pnand %p509_p11, %p503_p8 }
 0x2b8   :  { %513 = shalt.err (!%p510_p12)
}
 0x2b9   :  { %s514_s8 = scalar_lea.hbm %s694_s7, 128 }
 0x2ba   :  { %p515_p13 = scmp.ne.s32.totalorder %s694_s7, %s514_s8  ;;  %p518_p0 = scmp.lt.u32.totalorder %s514_s8, %s694_s7 }
 0x2bc   :  { %p520_p1 = pnand %p518_p0, %p515_p13 }
 0x2be   :  { %523 = shalt.err (!%p520_p1)
}
 0x2bf   :  { %s534_s13 = smov 128   ;;  %s535_s14 = smov 8  }
 0x2c0   :  { %357 = dma.vmem_to_hbm [thread:$0]  %s352_s5, 128, %s694_s7, [#allocation4], %s534_s13, %s534_s13, %s535_s14  }
 0x2c1   :  { %526 = dma.done.wait [#allocation4], 256  }
 0x2c2   :  { %527 = vsyncadd [#allocation4], 4294967040 }
 0x2c3   :  { %361 = vsyncpa [#allocation3], 1 }
 0x2c4   :  { %362 = vsyncpa [#allocation4], 1 }

</bundles_post_ra>
